<compile_context>
chip_gen: v7x
topology: tpu7x:2x2x1
jax: 0.10.0
libtpu: 0.0.40
codegen_flags: <defaults>
</compile_context>

<pallas_src>
import functools

import jax
import jax.numpy as jnp
from jax.experimental import pallas as pl
from jax.experimental.pallas import tpu as pltpu

KT = 3  # STblock.kernel_size


# ----------------------------------------------------------------------------
# Fused Pallas kernel (one sample per grid step)
# ----------------------------------------------------------------------------
def _stblock_kernel(x_ref, ahat_ref, w1_ref, b1_ref, wg_ref, bg_ref,
                    w2_ref, b2_ref, o_ref, *, kt, v, c0, cm, c2):
    """Time-major slabs, channels on lanes:
       x_ref   : (T*V, c0)      rows ordered (t, v); channels pre-padded to c0
       ahat_ref: (V, V)         D^-1/2 (A+I) D^-1/2 (dense, static graph)
       w1_ref  : (Kt, c0, 2*c0) causal-conv-1 weight, one (in,out) slab per tap
       b1_ref  : (1, 2*c0)
       wg_ref  : (c0, cm)       GCNConv linear (x @ W.T layout), cols padded to cm
       bg_ref  : (1, cm)
       w2_ref  : (Kt, cm, 2*c2) causal-conv-2 weight, one (in,out) slab per tap
       b2_ref  : (1, 2*c2)
       o_ref   : (T2*V, c2)     rows ordered (t, v)
    """
    t = x_ref.shape[0] // v
    t1 = t - kt + 1          # time steps after tmp_conv1
    t2 = t1 - kt + 1         # time steps after tmp_conv2

    x = x_ref[...]

    # ---- TemporalConvLayer 1 (causal conv + GLU): Kt-term sum of 2-D dots --
    conv1 = b1_ref[...]
    for k in range(kt):
        conv1 = conv1 + jnp.dot(x[k * v:(k + t1) * v, :], w1_ref[k],
                                preferred_element_type=jnp.float32)
    resid1 = x[(kt - 1) * v:, :]          # Align(c_in -> c0) == wrapper pre-pad
    h1 = (conv1[:, :c0] + resid1) * jax.nn.sigmoid(conv1[:, c0:])   # (T1*V, c0)

    # ---- GCNConv + ReLU: Ahat @ (X W) per timestep (dense V^2, no kron) ----
    xw = jnp.dot(h1, wg_ref[...], preferred_element_type=jnp.float32)  # (T1*V, cm)
    ahat = ahat_ref[...]
    bg = bg_ref[...]
    h2 = jnp.concatenate(
        [jnp.maximum(
            jnp.dot(ahat, xw[ti * v:(ti + 1) * v, :],
                    preferred_element_type=jnp.float32) + bg, 0.0)
         for ti in range(t1)], axis=0)                               # (T1*V, cm)

    # ---- TemporalConvLayer 2 (causal conv + GLU) ---------------------------
    conv2 = b2_ref[...]
    for k in range(kt):
        conv2 = conv2 + jnp.dot(h2[k * v:(k + t2) * v, :], w2_ref[k],
                                preferred_element_type=jnp.float32)
    resid2 = h2[(kt - 1) * v:, :]         # Align(c1 -> c2): cm == c2 here
    h3 = (conv2[:, :c2] + resid2) * jax.nn.sigmoid(conv2[:, c2:])    # (T2*V, c2)

    # TODO(synk): nn.Dropout is the identity in eval mode; training-mode
    # stochastic dropout (pltpu.prng_* + 1/(1-p) scaling) is not implemented.
    # TODO(synk): at toy widths (c2=8) the store uses 8/128 lanes; at real
    # model widths keep c2 a multiple of 128 (or fold V into lanes) so the
    # output store is lane-dense.
    o_ref[...] = h3.astype(o_ref.dtype)


# ----------------------------------------------------------------------------
# Jitted wrapper: one pallas_call, grid over the batch of samples
# ----------------------------------------------------------------------------
@jax.jit
def stblock_forward(params, x, ahat):
    """x: (B, c_in, n_vertex, ts_dim)  ->  (B, c2, T_out, n_vertex).

    Layout conversion to/from the time-major (T*V, C) slab happens only here
    (model entry/exit); chained STblocks should pass the slab straight through.
    """
    b, c_in, n_vertex, t = x.shape
    kt, c0, _ = params["w1"].shape
    cm = params["wg"].shape[1]
    c2 = params["b2"].shape[1] // 2
    t1 = t - kt + 1
    t2 = t1 - kt + 1

    # (B, C, V, T) -> (B, T, V, C); zero-pad channels to c0 (Align, hoisted);
    # flatten to the time-major slab (B, T*V, c0).
    x_tvc = jnp.transpose(x, (0, 3, 2, 1)).astype(jnp.float32)
    x_tvc = jnp.pad(x_tvc, ((0, 0), (0, 0), (0, 0), (0, c0 - c_in)))
    x_slab = x_tvc.reshape(b, t * n_vertex, c0)

    kernel = functools.partial(_stblock_kernel, kt=kt, v=n_vertex,
                               c0=c0, cm=cm, c2=c2)
    out_slab = pl.pallas_call(
        kernel,
        out_shape=jax.ShapeDtypeStruct((b, t2 * n_vertex, c2), jnp.float32),
        grid=(b,),
        in_specs=[
            pl.BlockSpec((None, t * n_vertex, c0), lambda i: (i, 0, 0)),
            pl.BlockSpec((n_vertex, n_vertex), lambda i: (0, 0)),   # resident
            pl.BlockSpec((kt, c0, 2 * c0), lambda i: (0, 0, 0)),    # resident
            pl.BlockSpec((1, 2 * c0), lambda i: (0, 0)),
            pl.BlockSpec((c0, cm), lambda i: (0, 0)),
            pl.BlockSpec((1, cm), lambda i: (0, 0)),
            pl.BlockSpec((kt, cm, 2 * c2), lambda i: (0, 0, 0)),
            pl.BlockSpec((1, 2 * c2), lambda i: (0, 0)),
        ],
        out_specs=pl.BlockSpec((None, t2 * n_vertex, c2), lambda i: (i, 0, 0)),
        compiler_params=pltpu.CompilerParams(
            dimension_semantics=("parallel",)),   # batch across v7x's two TCs
    )(x_slab, ahat, params["w1"], params["b1"], params["wg"], params["bg"],
      params["w2"], params["b2"])

    # model exit: (B, T2*V, c2) -> (B, c2, T2, V), matching the PyTorch output.
    out = out_slab.reshape(b, t2, n_vertex, c2)
    return jnp.transpose(out, (0, 3, 1, 2))


# ----------------------------------------------------------------------------
# One-time preprocessing (hoisted out of the forward path)
# ----------------------------------------------------------------------------
def normalized_adjacency(edge_index, num_nodes):
    """D^-1/2 (A + I) D^-1/2 as used by default PyG GCNConv."""
    a = jnp.zeros((num_nodes, num_nodes), jnp.float32)
    a = a.at[edge_index[1], edge_index[0]].add(1.0)   # message src -> dst
    a = a + jnp.eye(num_nodes, dtype=jnp.float32)     # add self loops
    deg = a.sum(axis=1)
    d_inv_sqrt = 1.0 / jnp.sqrt(deg)
    return d_inv_sqrt[:, None] * a * d_inv_sqrt[None, :]


def pack_params(tp, c_in):
    """PyTorch-layout STblock weights -> fused-kernel layout.  The Align
    channel zero-pads and the GCN output-column pad are folded in here once."""
    two_c0, _, kt, _ = tp["w1"].shape
    c0 = two_c0 // 2
    c1, _ = tp["wg"].shape
    c2 = tp["w2"].shape[0] // 2
    if c_in > c0 or c1 > c2:
        # TODO(synk): Align's 1x1-conv branch (c_in > c_out) not implemented.
        raise NotImplementedError("Align with c_in > c_out not implemented")
    cm = max(c1, c2)   # == c2 in the supported path
    # Conv2d weight (O, I, Kt, 1) -> per-tap (Kt, I padded to c0 / cm, O)
    w1 = jnp.zeros((kt, c0, 2 * c0), jnp.float32).at[:, :c_in, :].set(
        jnp.transpose(tp["w1"][:, :, :, 0], (2, 1, 0)))
    wg = jnp.zeros((c0, cm), jnp.float32).at[:, :c1].set(tp["wg"].T)
    bg = jnp.zeros((1, cm), jnp.float32).at[:, :c1].set(tp["bg"][None, :])
    w2 = jnp.zeros((kt, cm, 2 * c2), jnp.float32).at[:, :c1, :].set(
        jnp.transpose(tp["w2"][:, :, :, 0], (2, 1, 0)))
    return dict(w1=w1, b1=tp["b1"][None, :], wg=wg, bg=bg,
                w2=w2, b2=tp["b2"][None, :])


# ----------------------------------------------------------------------------
# Pure-JAX reference (independent formulation, PyTorch-layout weights)
# ----------------------------------------------------------------------------
def _ref_temporal_glu(x_tvc, w_oik, b_o, kt, c_out):
    t, _, c_in = x_tvc.shape
    t_out = t - kt + 1
    conv = sum(jnp.einsum("tvc,oc->tvo", x_tvc[k:k + t_out], w_oik[:, :, k])
               for k in range(kt)) + b_o[None, None, :]
    x_in = x_tvc[kt - 1:]
    if c_in < c_out:
        x_in = jnp.concatenate(
            [x_in, jnp.zeros(x_in.shape[:2] + (c_out - c_in,), x_in.dtype)],
            axis=-1)
    return (conv[..., :c_out] + x_in) * jax.nn.sigmoid(conv[..., c_out:])


def reference_forward(tp, x_cvt, ahat):
    """STblock.forward for ONE sample; x_cvt: (c_in, V, T) -> (1, c2, T_out, V)."""
    c0 = tp["b1"].shape[0] // 2
    c2 = tp["b2"].shape[0] // 2
    x_tvc = jnp.transpose(x_cvt, (2, 1, 0)).astype(jnp.float32)
    h1 = _ref_temporal_glu(x_tvc, tp["w1"][:, :, :, 0], tp["b1"], KT, c0)
    xw = jnp.einsum("tvc,dc->tvd", h1, tp["wg"])                  # X @ W.T
    h2 = jnp.maximum(jnp.einsum("uv,tvd->tud", ahat, xw)
                     + tp["bg"][None, None, :], 0.0)
    h3 = _ref_temporal_glu(h2, tp["w2"][:, :, :, 0], tp["b2"], KT, c2)
    return jnp.transpose(h3, (2, 0, 1))[None]


# ----------------------------------------------------------------------------
if __name__ == "__main__":
    last_block_channel = 4
    channels = (8, 8, 8)
    ts_dim = 10
    n_vertex = 8
    batch = 4
    c0, c1, c2 = channels

    key = jax.random.PRNGKey(0)
    kx, k1, k2, k3, k4, k5, k6 = jax.random.split(key, 7)

    # batch of node-feature tensors, each shaped as STblock.forward's x:
    # (last_block_channel, n_vertex, ts_dim)
    x = jax.random.normal(
        kx, (batch, last_block_channel, n_vertex, ts_dim), jnp.float32)

    # deterministic ring graph as edge_index (both directions)
    src = jnp.arange(n_vertex, dtype=jnp.int32)
    dst = (src + 1) % n_vertex
    edge_index = jnp.stack([jnp.concatenate([src, dst]),
                            jnp.concatenate([dst, src])])

    # deterministic parameters in native PyTorch layouts
    torch_params = dict(
        w1=0.1 * jax.random.normal(k1, (2 * c0, last_block_channel, KT, 1),
                                   jnp.float32),   # Conv2d weight (O, I, Kt, 1)
        b1=0.1 * jax.random.normal(k2, (2 * c0,), jnp.float32),
        wg=0.1 * jax.random.normal(k3, (c1, c0), jnp.float32),   # Linear (out,in)
        bg=0.1 * jax.random.normal(k4, (c1,), jnp.float32),
        w2=0.1 * jax.random.normal(k5, (2 * c2, c1, KT, 1), jnp.float32),
        b2=0.1 * jax.random.normal(k6, (2 * c2,), jnp.float32),
    )

    params = pack_params(torch_params, last_block_channel)
    ahat = normalized_adjacency(edge_index, n_vertex)   # static graph, (V, V)

    out = jax.block_until_ready(stblock_forward(params, x, ahat))
    t_out = ts_dim - 2 * (KT - 1)
    assert out.shape == (batch, c2, t_out, n_vertex), out.shape

    for i in range(batch):
        ref = reference_forward(torch_params, x[i], ahat)[0]
        assert jnp.allclose(out[i], ref, rtol=1e-4, atol=1e-4), \
            f"mismatch vs reference on sample {i}"

    print("KERNEL_OK")
</pallas_src>

<mosaic_0001>
module attributes {stable_mosaic.version = 11 : i64} {
  func.func @_stblock_kernel(%arg0: i32, %arg1: memref<1x80x8xf32, #tpu.memory_space<vmem>>, %arg2: memref<8x8xf32, #tpu.memory_space<vmem>>, %arg3: memref<3x8x16xf32, #tpu.memory_space<vmem>>, %arg4: memref<1x16xf32, #tpu.memory_space<vmem>>, %arg5: memref<8x8xf32, #tpu.memory_space<vmem>>, %arg6: memref<1x8xf32, #tpu.memory_space<vmem>>, %arg7: memref<3x8x16xf32, #tpu.memory_space<vmem>>, %arg8: memref<1x16xf32, #tpu.memory_space<vmem>>, %arg9: memref<1x48x8xf32, #tpu.memory_space<vmem>>) attributes {dimension_semantics = [#tpu.dimension_semantics<parallel>], iteration_bounds = array<i64: 4>, scalar_prefetch = 0 : i64, scratch_operands = 0 : i64, tpu.core_type = #tpu.core_type<tc>, window_params = [{transform_indices = @transform_0, window_bounds = array<i64: 1, 80, 8>}, {pipeline_mode = #tpu.pipeline_mode<synchronous>, transform_indices = @transform_1, window_bounds = array<i64: 8, 8>}, {pipeline_mode = #tpu.pipeline_mode<synchronous>, transform_indices = @transform_2, window_bounds = array<i64: 3, 8, 16>}, {pipeline_mode = #tpu.pipeline_mode<synchronous>, transform_indices = @transform_3, window_bounds = array<i64: 1, 16>}, {pipeline_mode = #tpu.pipeline_mode<synchronous>, transform_indices = @transform_4, window_bounds = array<i64: 8, 8>}, {pipeline_mode = #tpu.pipeline_mode<synchronous>, transform_indices = @transform_5, window_bounds = array<i64: 1, 8>}, {pipeline_mode = #tpu.pipeline_mode<synchronous>, transform_indices = @transform_6, window_bounds = array<i64: 3, 8, 16>}, {pipeline_mode = #tpu.pipeline_mode<synchronous>, transform_indices = @transform_7, window_bounds = array<i64: 1, 16>}, {transform_indices = @transform_8, window_bounds = array<i64: 1, 48, 8>}]} {
    %c0 = arith.constant 0 : index
    %c0_0 = arith.constant 0 : index
    %c0_1 = arith.constant 0 : index
    %0 = vector.load %arg1[%c0, %c0_0, %c0_1] : memref<1x80x8xf32, #tpu.memory_space<vmem>>, vector<1x80x8xf32>
    %1 = vector.shape_cast %0 : vector<1x80x8xf32> to vector<80x8xf32>
    %c0_2 = arith.constant 0 : index
    %c0_3 = arith.constant 0 : index
    %2 = vector.load %arg4[%c0_2, %c0_3] : memref<1x16xf32, #tpu.memory_space<vmem>>, vector<1x16xf32>
    %3 = vector.extract_strided_slice %1 {offsets = [0, 0], sizes = [64, 8], strides = [1, 1]} : vector<80x8xf32> to vector<64x8xf32>
    %c0_4 = arith.constant 0 : index
    %c0_5 = arith.constant 0 : index
    %c0_6 = arith.constant 0 : index
    %4 = vector.load %arg3[%c0_4, %c0_5, %c0_6] : memref<3x8x16xf32, #tpu.memory_space<vmem>>, vector<1x8x16xf32>
    %5 = vector.shape_cast %4 : vector<1x8x16xf32> to vector<8x16xf32>
    %cst = arith.constant dense<0.000000e+00> : vector<64x16xf32>
    %6 = tpu.matmul %3, %5, %cst {dimension_numbers = #tpu.dot_dimension_numbers<[1], [0], [0], [1], [0, 0, 1, 1], [], []>} : vector<64x8xf32>, vector<8x16xf32>, vector<64x16xf32> -> vector<64x16xf32>
    %7 = vector.broadcast %2 : vector<1x16xf32> to vector<64x16xf32>
    %8 = arith.addf %7, %6 : vector<64x16xf32>
    %9 = vector.extract_strided_slice %1 {offsets = [8, 0], sizes = [64, 8], strides = [1, 1]} : vector<80x8xf32> to vector<64x8xf32>
    %c1 = arith.constant 1 : index
    %c0_7 = arith.constant 0 : index
    %c0_8 = arith.constant 0 : index
    %10 = vector.load %arg3[%c1, %c0_7, %c0_8] : memref<3x8x16xf32, #tpu.memory_space<vmem>>, vector<1x8x16xf32>
    %11 = vector.shape_cast %10 : vector<1x8x16xf32> to vector<8x16xf32>
    %cst_9 = arith.constant dense<0.000000e+00> : vector<64x16xf32>
    %12 = tpu.matmul %9, %11, %cst_9 {dimension_numbers = #tpu.dot_dimension_numbers<[1], [0], [0], [1], [0, 0, 1, 1], [], []>} : vector<64x8xf32>, vector<8x16xf32>, vector<64x16xf32> -> vector<64x16xf32>
    %13 = arith.addf %8, %12 : vector<64x16xf32>
    %14 = vector.extract_strided_slice %1 {offsets = [16, 0], sizes = [64, 8], strides = [1, 1]} : vector<80x8xf32> to vector<64x8xf32>
    %c2 = arith.constant 2 : index
    %c0_10 = arith.constant 0 : index
    %c0_11 = arith.constant 0 : index
    %15 = vector.load %arg3[%c2, %c0_10, %c0_11] : memref<3x8x16xf32, #tpu.memory_space<vmem>>, vector<1x8x16xf32>
    %16 = vector.shape_cast %15 : vector<1x8x16xf32> to vector<8x16xf32>
    %cst_12 = arith.constant dense<0.000000e+00> : vector<64x16xf32>
    %17 = tpu.matmul %14, %16, %cst_12 {dimension_numbers = #tpu.dot_dimension_numbers<[1], [0], [0], [1], [0, 0, 1, 1], [], []>} : vector<64x8xf32>, vector<8x16xf32>, vector<64x16xf32> -> vector<64x16xf32>
    %18 = arith.addf %13, %17 : vector<64x16xf32>
    %19 = vector.extract_strided_slice %1 {offsets = [16, 0], sizes = [64, 8], strides = [1, 1]} : vector<80x8xf32> to vector<64x8xf32>
    %20 = vector.extract_strided_slice %18 {offsets = [0, 0], sizes = [64, 8], strides = [1, 1]} : vector<64x16xf32> to vector<64x8xf32>
    %21 = arith.addf %20, %19 : vector<64x8xf32>
    %22 = vector.extract_strided_slice %18 {offsets = [0, 8], sizes = [64, 8], strides = [1, 1]} : vector<64x16xf32> to vector<64x8xf32>
    %23 = arith.negf %22 : vector<64x8xf32>
    %24 = math.exp %23 : vector<64x8xf32>
    %cst_13 = arith.constant 1.000000e+00 : f32
    %25 = vector.broadcast %cst_13 : f32 to vector<64x8xf32>
    %26 = arith.addf %25, %24 : vector<64x8xf32>
    %27 = arith.divf %25, %26 : vector<64x8xf32>
    %28 = arith.mulf %21, %27 : vector<64x8xf32>
    %c0_14 = arith.constant 0 : index
    %c0_15 = arith.constant 0 : index
    %29 = vector.load %arg5[%c0_14, %c0_15] : memref<8x8xf32, #tpu.memory_space<vmem>>, vector<8x8xf32>
    %cst_16 = arith.constant dense<0.000000e+00> : vector<64x8xf32>
    %30 = tpu.matmul %28, %29, %cst_16 {dimension_numbers = #tpu.dot_dimension_numbers<[1], [0], [0], [1], [0, 0, 1, 1], [], []>} : vector<64x8xf32>, vector<8x8xf32>, vector<64x8xf32> -> vector<64x8xf32>
    %c0_17 = arith.constant 0 : index
    %c0_18 = arith.constant 0 : index
    %31 = vector.load %arg2[%c0_17, %c0_18] : memref<8x8xf32, #tpu.memory_space<vmem>>, vector<8x8xf32>
    %c0_19 = arith.constant 0 : index
    %c0_20 = arith.constant 0 : index
    %32 = vector.load %arg6[%c0_19, %c0_20] : memref<1x8xf32, #tpu.memory_space<vmem>>, vector<1x8xf32>
    %33 = vector.extract_strided_slice %30 {offsets = [0, 0], sizes = [8, 8], strides = [1, 1]} : vector<64x8xf32> to vector<8x8xf32>
    %cst_21 = arith.constant dense<0.000000e+00> : vector<8x8xf32>
    %34 = tpu.matmul %31, %33, %cst_21 {dimension_numbers = #tpu.dot_dimension_numbers<[1], [0], [0], [1], [0, 0, 1, 1], [], []>} : vector<8x8xf32>, vector<8x8xf32>, vector<8x8xf32> -> vector<8x8xf32>
    %35 = vector.broadcast %32 : vector<1x8xf32> to vector<8x8xf32>
    %36 = arith.addf %34, %35 : vector<8x8xf32>
    %cst_22 = arith.constant 0.000000e+00 : f32
    %37 = vector.broadcast %cst_22 : f32 to vector<8x8xf32>
    %38 = arith.maximumf %36, %37 : vector<8x8xf32>
    %39 = vector.extract_strided_slice %30 {offsets = [8, 0], sizes = [8, 8], strides = [1, 1]} : vector<64x8xf32> to vector<8x8xf32>
    %cst_23 = arith.constant dense<0.000000e+00> : vector<8x8xf32>
    %40 = tpu.matmul %31, %39, %cst_23 {dimension_numbers = #tpu.dot_dimension_numbers<[1], [0], [0], [1], [0, 0, 1, 1], [], []>} : vector<8x8xf32>, vector<8x8xf32>, vector<8x8xf32> -> vector<8x8xf32>
    %41 = vector.broadcast %32 : vector<1x8xf32> to vector<8x8xf32>
    %42 = arith.addf %40, %41 : vector<8x8xf32>
    %cst_24 = arith.constant 0.000000e+00 : f32
    %43 = vector.broadcast %cst_24 : f32 to vector<8x8xf32>
    %44 = arith.maximumf %42, %43 : vector<8x8xf32>
    %45 = vector.extract_strided_slice %30 {offsets = [16, 0], sizes = [8, 8], strides = [1, 1]} : vector<64x8xf32> to vector<8x8xf32>
    %cst_25 = arith.constant dense<0.000000e+00> : vector<8x8xf32>
    %46 = tpu.matmul %31, %45, %cst_25 {dimension_numbers = #tpu.dot_dimension_numbers<[1], [0], [0], [1], [0, 0, 1, 1], [], []>} : vector<8x8xf32>, vector<8x8xf32>, vector<8x8xf32> -> vector<8x8xf32>
    %47 = vector.broadcast %32 : vector<1x8xf32> to vector<8x8xf32>
    %48 = arith.addf %46, %47 : vector<8x8xf32>
    %cst_26 = arith.constant 0.000000e+00 : f32
    %49 = vector.broadcast %cst_26 : f32 to vector<8x8xf32>
    %50 = arith.maximumf %48, %49 : vector<8x8xf32>
    %51 = vector.extract_strided_slice %30 {offsets = [24, 0], sizes = [8, 8], strides = [1, 1]} : vector<64x8xf32> to vector<8x8xf32>
    %cst_27 = arith.constant dense<0.000000e+00> : vector<8x8xf32>
    %52 = tpu.matmul %31, %51, %cst_27 {dimension_numbers = #tpu.dot_dimension_numbers<[1], [0], [0], [1], [0, 0, 1, 1], [], []>} : vector<8x8xf32>, vector<8x8xf32>, vector<8x8xf32> -> vector<8x8xf32>
    %53 = vector.broadcast %32 : vector<1x8xf32> to vector<8x8xf32>
    %54 = arith.addf %52, %53 : vector<8x8xf32>
    %cst_28 = arith.constant 0.000000e+00 : f32
    %55 = vector.broadcast %cst_28 : f32 to vector<8x8xf32>
    %56 = arith.maximumf %54, %55 : vector<8x8xf32>
    %57 = vector.extract_strided_slice %30 {offsets = [32, 0], sizes = [8, 8], strides = [1, 1]} : vector<64x8xf32> to vector<8x8xf32>
    %cst_29 = arith.constant dense<0.000000e+00> : vector<8x8xf32>
    %58 = tpu.matmul %31, %57, %cst_29 {dimension_numbers = #tpu.dot_dimension_numbers<[1], [0], [0], [1], [0, 0, 1, 1], [], []>} : vector<8x8xf32>, vector<8x8xf32>, vector<8x8xf32> -> vector<8x8xf32>
    %59 = vector.broadcast %32 : vector<1x8xf32> to vector<8x8xf32>
    %60 = arith.addf %58, %59 : vector<8x8xf32>
    %cst_30 = arith.constant 0.000000e+00 : f32
    %61 = vector.broadcast %cst_30 : f32 to vector<8x8xf32>
    %62 = arith.maximumf %60, %61 : vector<8x8xf32>
    %63 = vector.extract_strided_slice %30 {offsets = [40, 0], sizes = [8, 8], strides = [1, 1]} : vector<64x8xf32> to vector<8x8xf32>
    %cst_31 = arith.constant dense<0.000000e+00> : vector<8x8xf32>
    %64 = tpu.matmul %31, %63, %cst_31 {dimension_numbers = #tpu.dot_dimension_numbers<[1], [0], [0], [1], [0, 0, 1, 1], [], []>} : vector<8x8xf32>, vector<8x8xf32>, vector<8x8xf32> -> vector<8x8xf32>
    %65 = vector.broadcast %32 : vector<1x8xf32> to vector<8x8xf32>
    %66 = arith.addf %64, %65 : vector<8x8xf32>
    %cst_32 = arith.constant 0.000000e+00 : f32
    %67 = vector.broadcast %cst_32 : f32 to vector<8x8xf32>
    %68 = arith.maximumf %66, %67 : vector<8x8xf32>
    %69 = vector.extract_strided_slice %30 {offsets = [48, 0], sizes = [8, 8], strides = [1, 1]} : vector<64x8xf32> to vector<8x8xf32>
    %cst_33 = arith.constant dense<0.000000e+00> : vector<8x8xf32>
    %70 = tpu.matmul %31, %69, %cst_33 {dimension_numbers = #tpu.dot_dimension_numbers<[1], [0], [0], [1], [0, 0, 1, 1], [], []>} : vector<8x8xf32>, vector<8x8xf32>, vector<8x8xf32> -> vector<8x8xf32>
    %71 = vector.broadcast %32 : vector<1x8xf32> to vector<8x8xf32>
    %72 = arith.addf %70, %71 : vector<8x8xf32>
    %cst_34 = arith.constant 0.000000e+00 : f32
    %73 = vector.broadcast %cst_34 : f32 to vector<8x8xf32>
    %74 = arith.maximumf %72, %73 : vector<8x8xf32>
    %75 = vector.extract_strided_slice %30 {offsets = [56, 0], sizes = [8, 8], strides = [1, 1]} : vector<64x8xf32> to vector<8x8xf32>
    %cst_35 = arith.constant dense<0.000000e+00> : vector<8x8xf32>
    %76 = tpu.matmul %31, %75, %cst_35 {dimension_numbers = #tpu.dot_dimension_numbers<[1], [0], [0], [1], [0, 0, 1, 1], [], []>} : vector<8x8xf32>, vector<8x8xf32>, vector<8x8xf32> -> vector<8x8xf32>
    %77 = vector.broadcast %32 : vector<1x8xf32> to vector<8x8xf32>
    %78 = arith.addf %76, %77 : vector<8x8xf32>
    %cst_36 = arith.constant 0.000000e+00 : f32
    %79 = vector.broadcast %cst_36 : f32 to vector<8x8xf32>
    %80 = arith.maximumf %78, %79 : vector<8x8xf32>
    %81 = tpu.concatenate %38, %44, %50, %56, %62, %68, %74, %80 in 0 : vector<8x8xf32>, vector<8x8xf32>, vector<8x8xf32>, vector<8x8xf32>, vector<8x8xf32>, vector<8x8xf32>, vector<8x8xf32>, vector<8x8xf32> -> vector<64x8xf32>
    %c0_37 = arith.constant 0 : index
    %c0_38 = arith.constant 0 : index
    %82 = vector.load %arg8[%c0_37, %c0_38] : memref<1x16xf32, #tpu.memory_space<vmem>>, vector<1x16xf32>
    %83 = vector.extract_strided_slice %81 {offsets = [0, 0], sizes = [48, 8], strides = [1, 1]} : vector<64x8xf32> to vector<48x8xf32>
    %c0_39 = arith.constant 0 : index
    %c0_40 = arith.constant 0 : index
    %c0_41 = arith.constant 0 : index
    %84 = vector.load %arg7[%c0_39, %c0_40, %c0_41] : memref<3x8x16xf32, #tpu.memory_space<vmem>>, vector<1x8x16xf32>
    %85 = vector.shape_cast %84 : vector<1x8x16xf32> to vector<8x16xf32>
    %cst_42 = arith.constant dense<0.000000e+00> : vector<48x16xf32>
    %86 = tpu.matmul %83, %85, %cst_42 {dimension_numbers = #tpu.dot_dimension_numbers<[1], [0], [0], [1], [0, 0, 1, 1], [], []>} : vector<48x8xf32>, vector<8x16xf32>, vector<48x16xf32> -> vector<48x16xf32>
    %87 = vector.broadcast %82 : vector<1x16xf32> to vector<48x16xf32>
    %88 = arith.addf %87, %86 : vector<48x16xf32>
    %89 = vector.extract_strided_slice %81 {offsets = [8, 0], sizes = [48, 8], strides = [1, 1]} : vector<64x8xf32> to vector<48x8xf32>
    %c1_43 = arith.constant 1 : index
    %c0_44 = arith.constant 0 : index
    %c0_45 = arith.constant 0 : index
    %90 = vector.load %arg7[%c1_43, %c0_44, %c0_45] : memref<3x8x16xf32, #tpu.memory_space<vmem>>, vector<1x8x16xf32>
    %91 = vector.shape_cast %90 : vector<1x8x16xf32> to vector<8x16xf32>
    %cst_46 = arith.constant dense<0.000000e+00> : vector<48x16xf32>
    %92 = tpu.matmul %89, %91, %cst_46 {dimension_numbers = #tpu.dot_dimension_numbers<[1], [0], [0], [1], [0, 0, 1, 1], [], []>} : vector<48x8xf32>, vector<8x16xf32>, vector<48x16xf32> -> vector<48x16xf32>
    %93 = arith.addf %88, %92 : vector<48x16xf32>
    %94 = vector.extract_strided_slice %81 {offsets = [16, 0], sizes = [48, 8], strides = [1, 1]} : vector<64x8xf32> to vector<48x8xf32>
    %c2_47 = arith.constant 2 : index
    %c0_48 = arith.constant 0 : index
    %c0_49 = arith.constant 0 : index
    %95 = vector.load %arg7[%c2_47, %c0_48, %c0_49] : memref<3x8x16xf32, #tpu.memory_space<vmem>>, vector<1x8x16xf32>
    %96 = vector.shape_cast %95 : vector<1x8x16xf32> to vector<8x16xf32>
    %cst_50 = arith.constant dense<0.000000e+00> : vector<48x16xf32>
    %97 = tpu.matmul %94, %96, %cst_50 {dimension_numbers = #tpu.dot_dimension_numbers<[1], [0], [0], [1], [0, 0, 1, 1], [], []>} : vector<48x8xf32>, vector<8x16xf32>, vector<48x16xf32> -> vector<48x16xf32>
    %98 = arith.addf %93, %97 : vector<48x16xf32>
    %99 = vector.extract_strided_slice %81 {offsets = [16, 0], sizes = [48, 8], strides = [1, 1]} : vector<64x8xf32> to vector<48x8xf32>
    %100 = vector.extract_strided_slice %98 {offsets = [0, 0], sizes = [48, 8], strides = [1, 1]} : vector<48x16xf32> to vector<48x8xf32>
    %101 = arith.addf %100, %99 : vector<48x8xf32>
    %102 = vector.extract_strided_slice %98 {offsets = [0, 8], sizes = [48, 8], strides = [1, 1]} : vector<48x16xf32> to vector<48x8xf32>
    %103 = arith.negf %102 : vector<48x8xf32>
    %104 = math.exp %103 : vector<48x8xf32>
    %cst_51 = arith.constant 1.000000e+00 : f32
    %105 = vector.broadcast %cst_51 : f32 to vector<48x8xf32>
    %106 = arith.addf %105, %104 : vector<48x8xf32>
    %107 = arith.divf %105, %106 : vector<48x8xf32>
    %108 = arith.mulf %101, %107 : vector<48x8xf32>
    %c0_52 = arith.constant 0 : index
    %c0_53 = arith.constant 0 : index
    %c0_54 = arith.constant 0 : index
    %109 = vector.load %arg9[%c0_52, %c0_53, %c0_54] : memref<1x48x8xf32, #tpu.memory_space<vmem>>, vector<1x48x8xf32>
    %110 = vector.shape_cast %109 : vector<1x48x8xf32> to vector<48x8xf32>
    %111 = vector.shape_cast %108 : vector<48x8xf32> to vector<1x48x8xf32>
    tpu.vector_store %arg9[%c0_52, %c0_53, %c0_54], %111 {strides = array<i32>} : memref<1x48x8xf32, #tpu.memory_space<vmem>>, vector<1x48x8xf32>,
    return
  }
  func.func @transform_0(%arg0: i32) -> (i32, i32, i32) {
    %c0_i32 = arith.constant 0 : i32
    %c0_i32_0 = arith.constant 0 : i32
    %c0_i32_1 = arith.constant 0 : i32
    return %arg0, %c0_i32, %c0_i32_0 : i32, i32, i32
  }
  func.func @transform_1(%arg0: i32) -> (i32, i32) {
    %c0_i32 = arith.constant 0 : i32
    %c0_i32_0 = arith.constant 0 : i32
    %c0_i32_1 = arith.constant 0 : i32
    return %c0_i32, %c0_i32_0 : i32, i32
  }
  func.func @transform_2(%arg0: i32) -> (i32, i32, i32) {
    %c0_i32 = arith.constant 0 : i32
    %c0_i32_0 = arith.constant 0 : i32
    %c0_i32_1 = arith.constant 0 : i32
    %c0_i32_2 = arith.constant 0 : i32
    return %c0_i32, %c0_i32_0, %c0_i32_1 : i32, i32, i32
  }
  func.func @transform_3(%arg0: i32) -> (i32, i32) {
    %c0_i32 = arith.constant 0 : i32
    %c0_i32_0 = arith.constant 0 : i32
    %c0_i32_1 = arith.constant 0 : i32
    return %c0_i32, %c0_i32_0 : i32, i32
  }
  func.func @transform_4(%arg0: i32) -> (i32, i32) {
    %c0_i32 = arith.constant 0 : i32
    %c0_i32_0 = arith.constant 0 : i32
    %c0_i32_1 = arith.constant 0 : i32
    return %c0_i32, %c0_i32_0 : i32, i32
  }
  func.func @transform_5(%arg0: i32) -> (i32, i32) {
    %c0_i32 = arith.constant 0 : i32
    %c0_i32_0 = arith.constant 0 : i32
    %c0_i32_1 = arith.constant 0 : i32
    return %c0_i32, %c0_i32_0 : i32, i32
  }
  func.func @transform_6(%arg0: i32) -> (i32, i32, i32) {
    %c0_i32 = arith.constant 0 : i32
    %c0_i32_0 = arith.constant 0 : i32
    %c0_i32_1 = arith.constant 0 : i32
    %c0_i32_2 = arith.constant 0 : i32
    return %c0_i32, %c0_i32_0, %c0_i32_1 : i32, i32, i32
  }
  func.func @transform_7(%arg0: i32) -> (i32, i32) {
    %c0_i32 = arith.constant 0 : i32
    %c0_i32_0 = arith.constant 0 : i32
    %c0_i32_1 = arith.constant 0 : i32
    return %c0_i32, %c0_i32_0 : i32, i32
  }
  func.func @transform_8(%arg0: i32) -> (i32, i32, i32) {
    %c0_i32 = arith.constant 0 : i32
    %c0_i32_0 = arith.constant 0 : i32
    %c0_i32_1 = arith.constant 0 : i32
    return %arg0, %c0_i32, %c0_i32_0 : i32, i32, i32
  }
}

</mosaic_0001>

<bundles_post_ra>
// kernel: stblock_forward.1
= control target key start
LH: loop header
LB: loop body
LE: loop exit
PB: predicated region body
PF: predicated region fallthrough
CT: control target
= control target key end

     0   :  { %s2432_s27 = smov 0   ;;  %s2697_s0 = inlined_call_operand.vmem [shape: f32[4,80,8], index: 0, kind: input, shape index: {}]   ;;  %s2698_s1 = inlined_call_operand.vmem [shape: f32[8,8], index: 1, kind: input, shape index: {}]   ;;  %s2699_s2 = inlined_call_operand.vmem [shape: f32[3,8,16], index: 2, kind: input, shape index: {}]   ;;  %s2700_s3 = inlined_call_operand.vmem [shape: f32[1,16], index: 3, kind: input, shape index: {}]   ;;  %s2701_s4 = inlined_call_operand.vmem [shape: f32[8,8], index: 4, kind: input, shape index: {}]   ;;  %s2702_s5 = inlined_call_operand.vmem [shape: f32[1,8], index: 5, kind: input, shape index: {}]   ;;  %s2703_s6 = inlined_call_operand.vmem [shape: f32[3,8,16], index: 6, kind: input, shape index: {}]   ;;  %s2704_s7 = inlined_call_operand.vmem [shape: f32[1,16], index: 7, kind: input, shape index: {}]   ;;  %s2705_s8 = inlined_call_operand.vmem [shape: f32[4,48,8], index: 8, kind: output, shape index: {}]  }
   0x1 LB: > { %s1975_s28 = sadd.s32 4294967295, %s2382_s27   ;;  %p1979_p0 = scmp.ge.s32.totalorder %s2382_s27, 1  ;;  %s2382_s27 = sphi %s2432_s27, %s18_s27  }
   0x2   : > { %p262_p1 = scmp.lt.s32.totalorder %s2382_s27, 5 }
   0x4   : > { %p263_p2 = pnand %p1979_p0, %p262_p1 }
   0x5   : > { %v1991_v0 = vld [vmem:[%s2699_s2 + $0x8] sm:$0xff] (!%p263_p2)  ;;  %p296_p3 = scmp.lt.s32.totalorder (!%p263_p2), %s1975_s28, 3  ;;  %v317_v1 = vld [vmem:[%s2699_s2] sm:$0xff] (!%p263_p2)  ;;  %v2000_v2 = vld [vmem:[%s2699_s2 + $0x10] sm:$0xff] (!%p263_p2)  ;;  %vm318_vm0 = vcmask (!%p263_p2), 64512   ;;  %s2384_s21 = smov (!%p263_p2), 120  }
   0x6   : > { %266 = sbr.rel (%p263_p2) target bundleno = 1230 (0x4ce), region = 52  ;;  %2150 = vmatprep.subr.mxu0 (!%p263_p2), %v1991_v0  ;;  %2136 = vmatprep.subr.mxu1 (!%p263_p2), %v317_v1  ;;  %v1990_v17 = vld [vmem:[%s2700_s3] ss:$0 sm:$0xff] (!%p263_p2)  ;;  %vm2386_vm1 = vmmov (!%p263_p2), 0  }
   0x7   : > { %2151 = vmatpush3.msra.mxu0 (!%p263_p2), %v1991_v0  ;;  %2137 = vmatpush3.msra.mxu1 (!%p263_p2), %v317_v1  ;;  %v794_v61 = vld [vmem:[%s2701_s4] sm:$0xff] (!%p263_p2) }
   0x8   : > { %2164 = vmatprep.subr.mxu0 (!%p263_p2), %v2000_v2  ;;  %2178 = vmatprep.subr.mxu1 (!%p263_p2), %v794_v61 }
   0xd   : > { %s2707_s28 = smov (!%p296_p3, %s1975_s28), 3 }
   0xe   : > { %s2307_s13 = smul.u32 80, %s2707_s28 }
   0xf   : > { %s2308_s14 = smul.u32 48, %s2707_s28 }
  0x10   : > { %s2455_s16 = scalar_lea.vmem %s2697_s0, %s2307_s13 }
  0x11   : > { %v307_v3 = vld [vmem:[%s2455_s16 + $0x8] sm:$0xff]  ;;  %v2459_v4 = vld [vmem:[%s2455_s16 + $0x10] sm:$0xff]  ;;  %v2462_v5 = vld [vmem:[%s2455_s16 + $0x18] sm:$0xff]  ;;  %s305_s17 = scalar_lea.vmem %s2705_s8, %s2308_s14 }
  0x12   : > { %2152 = vmatprep.mubr.msk.f32.mxu0 %vm318_vm0, %v307_v3  ;;  %v306_v6 = vld [vmem:[%s2455_s16] sm:$0xff]  ;;  %v2475_v8 = vld [vmem:[%s2455_s16 + $0x28] sm:$0xff]  ;;  %v2485_v9 = vld [vmem:[%s2455_s16 + $0x30] sm:$0xff] }
  0x13   : > { %2153 = vmatmul.mubr.msk.f32.vlgmr.msra.gmra.mrb[0].mxu0 %vm318_vm0, %v2459_v4  ;;  %v2471_v7 = vld [vmem:[%s2455_s16 + $0x20] sm:$0xff]  ;;  %2138 = vmatprep.mubr.msk.f32.mxu1 %vm318_vm0, %v306_v6  ;;  %v2488_v10 = vld [vmem:[%s2455_s16 + $0x38] sm:$0xff]  ;;  %v2524_v12 = vld [vmem:[%s2455_s16 + $0x48] sm:$0xff] }
  0x14   : > { %2155 = vmatprep.mubr.msk.f32.mxu0 %vm318_vm0, %v2462_v5  ;;  %2139 = vmatmul.mubr.msk.f32.vlgmr.msra.gmra.mrb[0].mxu1 %vm318_vm0, %v307_v3  ;;  %v2499_v11 = vld [vmem:[%s2455_s16 + $0x40] sm:$0xff] }
  0x15   : > { %2165 = vmatpush3.msra.mxu0 %v2000_v2  ;;  %2141 = vmatprep.mubr.msk.f32.mxu1 %vm318_vm0, %v2459_v4 }
  0x16   : > { %2179 = vmatpush3.msra.mxu1 %v794_v61  ;;  %v2048_v61 = vld [vmem:[%s2703_s6 + $0x10] sm:$0xff] }
  0x17   : > { %2156 = vmatmul.mubr.msk.f32.gmra.mrb[2].mxu0 %vm318_vm0, %v2471_v7 }
  0x18   : > { %2158 = vmatprep.mubr.msk.f32.mxu0 %vm318_vm0, %v2475_v8  ;;  %2142 = vmatmul.mubr.msk.f32.gmra.mrb[2].mxu1 %vm318_vm0, %v2462_v5 }
  0x19   : > { %2144 = vmatprep.mubr.msk.f32.mxu1 %vm318_vm0, %v2471_v7 }
  0x1b   : > { %2159 = vmatmul.mubr.msk.f32.gmra.mrb[4].mxu0 %vm318_vm0, %v2485_v9 }
  0x1c   : > { %2161 = vmatprep.mubr.msk.f32.mxu0 %vm318_vm0, %v2488_v10  ;;  %2145 = vmatmul.mubr.msk.f32.gmra.mrb[4].mxu1 %vm318_vm0, %v2475_v8 }
  0x1d   : > { %2147 = vmatprep.mubr.msk.f32.mxu1 %vm318_vm0, %v2485_v9 }
  0x1f   : > { %2162 = vmatmul.mubr.msk.f32.gmra.mrb[6].mxu0 %vm318_vm0, %v2499_v11 }
  0x20   : > { %2166 = vmatprep.mubr.msk.f32.mxu0 %vm318_vm0, %v2459_v4  ;;  %2148 = vmatmul.mubr.msk.f32.gmra.mrb[6].mxu1 %vm318_vm0, %v2488_v10 }
  0x23   : > { %2167 = vmatmul.mubr.msk.f32.vlgmr.msra.gmra.mrb[0].mxu0 %vm318_vm0, %v2462_v5 }
  0x24   : > { %2169 = vmatprep.mubr.msk.f32.mxu0 %vm318_vm0, %v2471_v7 }
  0x27   : > { %2170 = vmatmul.mubr.msk.f32.gmra.mrb[2].mxu0 %vm318_vm0, %v2475_v8 }
  0x28   : > { %2172 = vmatprep.mubr.msk.f32.mxu0 %vm318_vm0, %v2485_v9 }
  0x2b   : > { %2173 = vmatmul.mubr.msk.f32.gmra.mrb[4].mxu0 %vm318_vm0, %v2488_v10 }
  0x2c   : > { %2175 = vmatprep.mubr.msk.f32.mxu0 %vm318_vm0, %v2499_v11 }
  0x2f   : > { %2176 = vmatmul.mubr.msk.f32.gmra.mrb[6].mxu0 %vm318_vm0, %v2524_v12 }
  0xe7   : > { %v2140_v13 = vpop.f32.mrb[0].mxu1 }
  0xe8   : > { %v409_v14 = vpop.f32.mrb[1].mxu1  ;;  %v455_v20 = vadd.f32 %v2140_v13, %v1990_v17 }
  0xe9   : > { %v454_v21 = vadd.f32 %v1990_v17, %v409_v14 }
  0xeb   : > { %v2143_v15 = vpop.f32.mrb[2].mxu1 }
  0xec   : > { %v419_v16 = vpop.f32.mrb[3].mxu1  ;;  %v457_v27 = vadd.f32 %v2143_v15, %v1990_v17 }
  0xed   : > { %v456_v29 = vadd.f32 %v1990_v17, %v419_v16 }
  0xef   : > { %v2146_v18 = vpop.f32.mrb[4].mxu1 }
  0xf0   : > { %v429_v19 = vpop.f32.mrb[5].mxu1  ;;  %v459_v35 = vadd.f32 %v2146_v18, %v1990_v17 }
  0xf1   : > { %v458_v37 = vadd.f32 %v1990_v17, %v429_v19 }
  0xf3   : > { %v2149_v22 = vpop.f32.mrb[6].mxu1 }
  0xf4   : > { %v439_v23 = vpop.f32.mrb[7].mxu1  ;;  %v461_v43 = vadd.f32 %v2149_v22, %v1990_v17 }
  0xf5   : > { %v460_v45 = vadd.f32 %v1990_v17, %v439_v23 }
  0xf6   : > { %v2168_v24 = vpop.f32.mrb[0].mxu0 }
  0xf7   : > { %v2531_v25 = vadd.f32 %v2168_v24, %v455_v20  ;;  %v651_v26 = vpop.f32.mrb[1].mxu0 }
  0xf8   : > { %v2533_v28 = vadd.f32 %v651_v26, %v454_v21 }
  0xf9   : > { %v2010_v30 = vmul.f32 -1.442695, %v2531_v25 }
  0xfa   : > { %v2009_v31 = vmul.f32 -1.442695, %v2533_v28  ;;  %v2171_v32 = vpop.f32.mrb[2].mxu0  ;;  %v698_v23 = vadd.f32 %v2533_v28, %v2459_v4 }
  0xfb   : > { %2320 = vpow2.f32 %v2010_v30  ;;  %v2537_v33 = vadd.f32 %v2171_v32, %v457_v27  ;;  %v661_v34 = vpop.f32.mrb[3].mxu0  ;;  %v699_v27 = vadd.f32 %v2531_v25, %v2462_v5 }
  0xfc   : > { %2322 = vpow2.f32 %v2009_v31  ;;  %v2539_v36 = vadd.f32 %v661_v34, %v456_v29 }
  0xfd   : > { %v2012_v38 = vmul.f32 -1.442695, %v2537_v33 }
  0xfe   : > { %v2011_v39 = vmul.f32 -1.442695, %v2539_v36  ;;  %v2174_v40 = vpop.f32.mrb[4].mxu0  ;;  %v700_v29 = vadd.f32 %v2539_v36, %v2471_v7 }
  0xff   : > { %2324 = vpow2.f32 %v2012_v38  ;;  %v2543_v41 = vadd.f32 %v2174_v40, %v459_v35  ;;  %v671_v42 = vpop.f32.mrb[5].mxu0  ;;  %v701_v35 = vadd.f32 %v2537_v33, %v2475_v8 }
 0x100   : > { %2326 = vpow2.f32 %v2011_v39  ;;  %v2545_v44 = vadd.f32 %v671_v42, %v458_v37 }
 0x101   : > { %v2014_v46 = vmul.f32 -1.442695, %v2543_v41  ;;  %v703_v7 = vadd.f32 %v2543_v41, %v2488_v10  ;;  %v2385_v10 = vmov 0.0  }
 0x102   : > { %v2013_v47 = vmul.f32 -1.442695, %v2545_v44  ;;  %v2177_v48 = vpop.f32.mrb[6].mxu0  ;;  %v702_v4 = vadd.f32 %v2545_v44, %v2485_v9  ;;  %2192 = vmatprep.subr.mxu1 %v2385_v10 }
 0x103   : > { %2328 = vpow2.f32 %v2014_v46  ;;  %v2549_v49 = vadd.f32 %v2177_v48, %v461_v43  ;;  %v681_v50 = vpop.f32.mrb[7].mxu0 }
 0x104   : > { %2330 = vpow2.f32 %v2013_v47  ;;  %v2551_v51 = vadd.f32 %v681_v50, %v460_v45  ;;  %v2041_v50 = vld [vmem:[%s2703_s6 + $0x8] sm:$0xff] }
 0x105   : > { %v2321_v52 = vpop.eup %2320  ;;  %v2016_v53 = vmul.f32 -1.442695, %v2549_v49  ;;  %v705_v39 = vadd.f32 %v2549_v49, %v2524_v12  ;;  %v1504_v49 = vld [vmem:[%s2703_s6] sm:$0xff] }
 0x106   : > { %v2323_v54 = vpop.eup %2322  ;;  %v2015_v55 = vmul.f32 -1.442695, %v2551_v51  ;;  %v731_v57 = vadd.f32 1.0, %v2321_v52  ;;  %v704_v8 = vadd.f32 %v2551_v51, %v2499_v11  ;;  %v924_v11 = vld [vmem:[%s2698_s1] sm:$0xff]  ;;  %2232 = vmatprep.subr.mxu0 %v1504_v49 }
 0x107   : > { %v730_v56 = vadd.f32 1.0, %v2323_v54  ;;  %2332 = vpow2.f32 %v2016_v53  ;;  %2233 = vmatpush3.msra.mxu0 %v1504_v49  ;;  %v2025_v51 = vld [vmem:[%s2702_s5] ss:$0 sm:$0xff] }
 0x108   : > { %2243 = vmatprep.subr.mxu0 %v2041_v50 }
 0x109   : > { %v2325_v58 = vpop.eup %2324  ;;  %2334 = vrcp.f32 %v730_v56 }
 0x10a   : > { %v2327_v59 = vpop.eup %2326  ;;  %2336 = vpow2.f32 %v2015_v55  ;;  %v733_v62 = vadd.f32 1.0, %v2325_v58 }
 0x10b   : > { %v732_v60 = vadd.f32 1.0, %v2327_v59  ;;  %2338 = vrcp.f32 %v731_v57 }
 0x10d   : > { %v2329_v63 = vpop.eup %2328  ;;  %2340 = vrcp.f32 %v732_v60 }
 0x10e   : > { %v2331_v0 = vpop.eup %2330  ;;  %2342 = vrcp.f32 %v733_v62  ;;  %v735_v2 = vadd.f32 1.0, %v2329_v63 }
 0x10f   : > { %v734_v1 = vadd.f32 1.0, %v2331_v0 }
 0x111   : > { %2344 = vrcp.f32 %v734_v1  ;;  %v2333_v3 = vpop.eup %2332 }
 0x112   : > { %2346 = vrcp.f32 %v735_v2  ;;  %v737_v14 = vadd.f32 1.0, %v2333_v3 }
 0x113   : > { %v2335_v6 = vpop.eup %2334 }
 0x114   : > { %v2337_v13 = vpop.eup %2336  ;;  %762 = vrot.lane.b32.xlu0 %v2335_v6, %s2384_s21 }
 0x115   : > { %v736_v15 = vadd.f32 1.0, %v2337_v13  ;;  %v2339_v16 = vpop.eup %2338 }
 0x117   : > { %v2341_v17 = vpop.eup %2340  ;;  %2348 = vrcp.f32 %v736_v15 }
 0x118   : > { %764 = vrot.lane.b32.xlu0 %v2339_v16, %s2384_s21  ;;  %766 = vrot.lane.b32.xlu1 %v2341_v17, %s2384_s21  ;;  %2350 = vrcp.f32 %v737_v14  ;;  %v2343_v18 = vpop.eup %2342 }
 0x11b   : > { %v2345_v19 = vpop.eup %2344 }
 0x11c   : > { %768 = vrot.lane.b32.xlu1 %v2343_v18, %s2384_s21  ;;  %770 = vrot.lane.b32.xlu0 %v2345_v19, %s2384_s21  ;;  %v2347_v20 = vpop.eup %2346 }
 0x120   : > { %772 = vrot.lane.b32.xlu1 %v2347_v20, %s2384_s21 }
 0x121   : > { %v2349_v21 = vpop.eup %2348 }
 0x122   : > { %774 = vrot.lane.b32.xlu0 %v2349_v21, %s2384_s21  ;;  %v2351_v22 = vpop.eup %2350 }
 0x124   : > { %776 = vrot.lane.b32.xlu1 %v2351_v22, %s2384_s21 }
 0x186   : > { %v763_v24 = vpop.permute.xlu0 %762 }
 0x187   : > { %v786_v26 = vmul.f32 %v763_v24, %v698_v23 }
 0x189   : > { %2180 = vmatprep.mubr.msk.f32.mxu1 %vm318_vm0, %v786_v26 }
 0x18a   : > { %v765_v30 = vpop.permute.xlu0 %764  ;;  %v767_v31 = vpop.permute.xlu1 %766 }
 0x18b   : > { %v787_v32 = vmul.f32 %v765_v30, %v699_v27  ;;  %v788_v34 = vmul.f32 %v767_v31, %v700_v29  ;;  %v2040_v31 = vld [vmem:[%s2704_s7] ss:$0 sm:$0xff] }
 0x18d   : > { %2181 = vmatmul.mubr.msk.f32.vlgmr.msra.gmra.mrb[8].mxu1 %vm318_vm0, %v787_v32 }
 0x18e   : > { %v769_v28 = vpop.permute.xlu1 %768  ;;  %2183 = vmatprep.mubr.msk.f32.mxu1 %vm318_vm0, %v788_v34  ;;  %v771_v37 = vpop.permute.xlu0 %770 }
 0x18f   : > { %v789_v5 = vmul.f32 %v769_v28, %v701_v35  ;;  %v790_v25 = vmul.f32 %v771_v37, %v702_v4 }
 0x191   : > { %2184 = vmatmul.mubr.msk.f32.gmra.mrb[10].mxu1 %vm318_vm0, %v789_v5 }
 0x192   : > { %v773_v36 = vpop.permute.xlu1 %772  ;;  %2186 = vmatprep.mubr.msk.f32.mxu1 %vm318_vm0, %v790_v25 }
 0x193   : > { %v791_v38 = vmul.f32 %v773_v36, %v703_v7 }
 0x194   : > { %v775_v33 = vpop.permute.xlu0 %774 }
 0x195   : > { %v792_v9 = vmul.f32 %v775_v33, %v704_v8  ;;  %2187 = vmatmul.mubr.msk.f32.gmra.mrb[12].mxu1 %vm318_vm0, %v791_v38 }
 0x196   : > { %v777_v40 = vpop.permute.xlu1 %776 }
 0x197   : > { %v793_v42 = vmul.f32 %v777_v40, %v705_v39  ;;  %2189 = vmatprep.mubr.msk.f32.mxu1 %vm318_vm0, %v792_v9 }
 0x199   : > { %2190 = vmatmul.mubr.msk.f32.gmra.mrb[14].mxu1 %vm318_vm0, %v793_v42 }
 0x19a   : > { %2194 = vmatprep.mubr.msk.f32.mxu1 %vm2386_vm1, %v2385_v10 }
 0x260   : > { %v2182_v41 = vpop.f32.mrb[8].mxu1 }
 0x261   : > { %v885_v43 = vpop.f32.mrb[9].mxu1 }
 0x262   : > { %2193 = vmatpush3.msra.mxu1 %v885_v43 }
 0x263   : > { %2195 = vmatmul.mubr.msk.f32.vlgmr.msra.gmra.mrb[16].mxu1 %vm318_vm0, %v924_v11  ;;  %2197 = vmatprep.subr.mxu1 %v2385_v10 }
 0x264   : > { %v2185_v12 = vpop.f32.mrb[10].mxu1  ;;  %2198 = vmatpush3.msra.mxu1 %v2182_v41  ;;  %2199 = vmatprep.mubr.msk.f32.mxu1 %vm2386_vm1, %v2385_v10 }
 0x265   : > { %v895_v44 = vpop.f32.mrb[11].mxu1  ;;  %2202 = vmatprep.subr.mxu1 %v2385_v10 }
 0x267   : > { %2200 = vmatmul.mubr.msk.f32.vlgmr.msra.gmra.mrb[18].mxu1 %vm318_vm0, %v924_v11 }
 0x268   : > { %2203 = vmatpush3.msra.mxu1 %v895_v44  ;;  %v2188_v45 = vpop.f32.mrb[12].mxu1  ;;  %2204 = vmatprep.mubr.msk.f32.mxu1 %vm2386_vm1, %v2385_v10 }
 0x269   : > { %v905_v46 = vpop.f32.mrb[13].mxu1  ;;  %2207 = vmatprep.subr.mxu1 %v2385_v10 }
 0x26b   : > { %2205 = vmatmul.mubr.msk.f32.vlgmr.msra.gmra.mrb[20].mxu1 %vm318_vm0, %v924_v11 }
 0x26c   : > { %2208 = vmatpush3.msra.mxu1 %v2185_v12  ;;  %v2191_v47 = vpop.f32.mrb[14].mxu1  ;;  %2209 = vmatprep.mubr.msk.f32.mxu1 %vm2386_vm1, %v2385_v10 }
 0x26d   : > { %v915_v48 = vpop.f32.mrb[15].mxu1  ;;  %2212 = vmatprep.subr.mxu1 %v2385_v10 }
 0x26f   : > { %2210 = vmatmul.mubr.msk.f32.vlgmr.msra.gmra.mrb[22].mxu1 %vm318_vm0, %v924_v11 }
 0x270   : > { %2213 = vmatpush3.msra.mxu1 %v905_v46  ;;  %2214 = vmatprep.mubr.msk.f32.mxu1 %vm2386_vm1, %v2385_v10 }
 0x271   : > { %2217 = vmatprep.subr.mxu1 %v2385_v10 }
 0x273   : > { %2215 = vmatmul.mubr.msk.f32.vlgmr.msra.gmra.mrb[24].mxu1 %vm318_vm0, %v924_v11 }
 0x274   : > { %2218 = vmatpush3.msra.mxu1 %v2188_v45  ;;  %2219 = vmatprep.mubr.msk.f32.mxu1 %vm2386_vm1, %v2385_v10 }
 0x275   : > { %2222 = vmatprep.subr.mxu1 %v2385_v10 }
 0x277   : > { %2220 = vmatmul.mubr.msk.f32.vlgmr.msra.gmra.mrb[26].mxu1 %vm318_vm0, %v924_v11 }
 0x278   : > { %2223 = vmatpush3.msra.mxu1 %v915_v48  ;;  %2224 = vmatprep.mubr.msk.f32.mxu1 %vm2386_vm1, %v2385_v10 }
 0x279   : > { %2227 = vmatprep.subr.mxu1 %v2385_v10 }
 0x27b   : > { %2225 = vmatmul.mubr.msk.f32.vlgmr.msra.gmra.mrb[28].mxu1 %vm318_vm0, %v924_v11 }
 0x27c   : > { %2228 = vmatpush3.msra.mxu1 %v2191_v47  ;;  %2229 = vmatprep.mubr.msk.f32.mxu1 %vm2386_vm1, %v2385_v10 }
 0x27f   : > { %2230 = vmatmul.mubr.msk.f32.vlgmr.msra.gmra.mrb[30].mxu1 %vm318_vm0, %v924_v11 }
 0x336   : > { %v1001_v52 = vpop.f32.mrb[16].mxu1 }
 0x337   : > { %v1002_v53 = vadd.f32 %v2025_v51, %v1001_v52  ;;  %v2196_v54 = vpop.f32.mrb[17].mxu1 }
 0x339   : > { %v1005_v55 = vmax.f32 %v1002_v53, 0.0 }
 0x33a   : > { %v1072_v56 = vpop.f32.mrb[18].mxu1 }
 0x33b   : > { %v1073_v57 = vadd.f32 %v2025_v51, %v1072_v56  ;;  %v2201_v58 = vpop.f32.mrb[19].mxu1  ;;  %2234 = vmatprep.mubr.msk.f32.mxu0 %vm318_vm0, %v1005_v55 }
 0x33d   : > { %v1076_v59 = vmax.f32 %v1073_v57, 0.0 }
 0x33e   : > { %v1143_v60 = vpop.f32.mrb[20].mxu1 }
 0x33f   : > { %v1144_v62 = vadd.f32 %v2025_v51, %v1143_v60  ;;  %v2206_v63 = vpop.f32.mrb[21].mxu1  ;;  %2235 = vmatmul.mubr.msk.f32.vlgmr.msra.gmra.mrb[8].mxu0 %vm318_vm0, %v1076_v59 }
 0x340   : > { %2244 = vmatpush3.msra.mxu0 %v2041_v50 }
 0x341   : > { %v2623_v0 = vmax.f32 %v1144_v62, 0.0  ;;  %2254 = vmatprep.subr.mxu0 %v2048_v61 }
 0x342   : > { %v1214_v1 = vpop.f32.mrb[22].mxu1 }
 0x343   : > { %v1215_v2 = vadd.f32 %v2025_v51, %v1214_v1  ;;  %v2211_v3 = vpop.f32.mrb[23].mxu1  ;;  %2237 = vmatprep.mubr.msk.f32.mxu0 %vm318_vm0, %v2623_v0 }
 0x345   : > { %v2627_v6 = vmax.f32 %v1215_v2, 0.0 }
 0x346   : > { %v1285_v13 = vpop.f32.mrb[24].mxu1 }
 0x347   : > { %v1286_v14 = vadd.f32 %v2025_v51, %v1285_v13  ;;  %v2216_v15 = vpop.f32.mrb[25].mxu1  ;;  %2238 = vmatmul.mubr.msk.f32.gmra.mrb[10].mxu0 %vm318_vm0, %v2627_v6 }
 0x349   : > { %v2631_v16 = vmax.f32 %v1286_v14, 0.0 }
 0x34a   : > { %v1356_v17 = vpop.f32.mrb[26].mxu1 }
 0x34b   : > { %v1357_v18 = vadd.f32 %v2025_v51, %v1356_v17  ;;  %2240 = vmatprep.mubr.msk.f32.mxu0 %vm318_vm0, %v2631_v16  ;;  %v2221_v19 = vpop.f32.mrb[27].mxu1 }
 0x34d   : > { %v2635_v20 = vmax.f32 %v1357_v18, 0.0 }
 0x34e   : > { %v1427_v21 = vpop.f32.mrb[28].mxu1 }
 0x34f   : > { %2241 = vmatmul.mubr.msk.f32.gmra.mrb[12].mxu0 %vm318_vm0, %v2635_v20  ;;  %v2226_v22 = vpop.f32.mrb[29].mxu1  ;;  %v1428_v24 = vadd.f32 %v2025_v51, %v1427_v21 }
 0x350   : > { %2245 = vmatprep.mubr.msk.f32.mxu0 %vm318_vm0, %v1076_v59 }
 0x351   : > { %v2644_v27 = vmax.f32 %v1428_v24, 0.0 }
 0x352   : > { %v1498_v23 = vpop.f32.mrb[30].mxu1 }
 0x353   : > { %2246 = vmatmul.mubr.msk.f32.vlgmr.msra.gmra.mrb[8].mxu0 %vm318_vm0, %v2623_v0  ;;  %v2231_v26 = vpop.f32.mrb[31].mxu1  ;;  %v2656_v29 = vadd.f32 %v2025_v51, %v1498_v23 }
 0x354   : > { %2248 = vmatprep.mubr.msk.f32.mxu0 %vm318_vm0, %v2627_v6  ;;  %2255 = vmatpush3.msra.mxu0 %v2048_v61 }
 0x355   : > { %v1502_v30 = vmax.f32 %v2656_v29, 0.0 }
 0x357   : > { %2249 = vmatmul.mubr.msk.f32.gmra.mrb[10].mxu0 %vm318_vm0, %v2631_v16 }
 0x358   : > { %2251 = vmatprep.mubr.msk.f32.mxu0 %vm318_vm0, %v2635_v20 }
 0x35b   : > { %2252 = vmatmul.mubr.msk.f32.gmra.mrb[12].mxu0 %vm318_vm0, %v2644_v27 }
 0x35c   : > { %2256 = vmatprep.mubr.msk.f32.mxu0 %vm318_vm0, %v2623_v0 }
 0x35f   : > { %2257 = vmatmul.mubr.msk.f32.vlgmr.msra.gmra.mrb[8].mxu0 %vm318_vm0, %v2627_v6 }
 0x360   : > { %2259 = vmatprep.mubr.msk.f32.mxu0 %vm318_vm0, %v2631_v16 }
 0x363   : > { %2260 = vmatmul.mubr.msk.f32.gmra.mrb[10].mxu0 %vm318_vm0, %v2635_v20 }
 0x364   : > { %2262 = vmatprep.mubr.msk.f32.mxu0 %vm318_vm0, %v2644_v27 }
 0x367   : > { %2263 = vmatmul.mubr.msk.f32.gmra.mrb[12].mxu0 %vm318_vm0, %v1502_v30 }
 0x432   : > { %v2258_v32 = vpop.f32.mrb[8].mxu0 }
 0x433   : > { %v2281_v34 = vadd.f32 %v2258_v32, %v2040_v31  ;;  %v1807_v35 = vpop.f32.mrb[9].mxu0 }
 0x434   : > { %v2282_v4 = vadd.f32 %v2040_v31, %v1807_v35 }
 0x435   : > { %v2056_v28 = vmul.f32 -1.442695, %v2281_v34  ;;  %v1843_v58 = vadd.f32 %v2281_v34, %v2627_v6 }
 0x436   : > { %v2055_v37 = vmul.f32 -1.442695, %v2282_v4  ;;  %v2261_v5 = vpop.f32.mrb[10].mxu0  ;;  %v1842_v60 = vadd.f32 %v2282_v4, %v2623_v0 }
 0x437   : > { %2352 = vpow2.f32 %v2056_v28  ;;  %v2283_v25 = vadd.f32 %v2261_v5, %v2040_v31  ;;  %v1817_v7 = vpop.f32.mrb[11].mxu0 }
 0x438   : > { %2354 = vpow2.f32 %v2055_v37  ;;  %v2284_v36 = vadd.f32 %v2040_v31, %v1817_v7 }
 0x439   : > { %v2058_v38 = vmul.f32 -1.442695, %v2283_v25  ;;  %v1845_v1 = vadd.f32 %v2283_v25, %v2635_v20 }
 0x43a   : > { %v2057_v8 = vmul.f32 -1.442695, %v2284_v36  ;;  %v2264_v33 = vpop.f32.mrb[12].mxu0  ;;  %v1844_v3 = vadd.f32 %v2284_v36, %v2631_v16 }
 0x43b   : > { %2356 = vpow2.f32 %v2058_v38  ;;  %v2285_v9 = vadd.f32 %v2264_v33, %v2040_v31  ;;  %v1827_v39 = vpop.f32.mrb[13].mxu0 }
 0x43c   : > { %2358 = vpow2.f32 %v2057_v8  ;;  %v2286_v40 = vadd.f32 %v2040_v31, %v1827_v39 }
 0x43d   : > { %v2060_v42 = vmul.f32 -1.442695, %v2285_v9  ;;  %v1847_v0 = vadd.f32 %v2285_v9, %v1502_v30 }
 0x43e   : > { %v2059_v10 = vmul.f32 -1.442695, %v2286_v40  ;;  %v1846_v17 = vadd.f32 %v2286_v40, %v2644_v27 }
 0x43f   : > { %2360 = vpow2.f32 %v2060_v42 }
 0x440   : > { %2362 = vpow2.f32 %v2059_v10 }
 0x441   : > { %v2353_v41 = vpop.eup %2352 }
 0x442   : > { %v2355_v11 = vpop.eup %2354  ;;  %v1867_v43 = vadd.f32 1.0, %v2353_v41 }
 0x443   : > { %v1866_v12 = vadd.f32 1.0, %v2355_v11 }
 0x444   : > { %2364 = vrcp.f32 %v1867_v43 }
 0x445   : > { %v2357_v44 = vpop.eup %2356  ;;  %2366 = vrcp.f32 %v1866_v12 }
 0x446   : > { %v2359_v45 = vpop.eup %2358  ;;  %v1869_v46 = vadd.f32 1.0, %v2357_v44 }
 0x447   : > { %v1868_v47 = vadd.f32 1.0, %v2359_v45 }
 0x448   : > { %2368 = vrcp.f32 %v1869_v46 }
 0x449   : > { %v2361_v48 = vpop.eup %2360  ;;  %2370 = vrcp.f32 %v1868_v47 }
 0x44a   : > { %v2363_v49 = vpop.eup %2362  ;;  %v1871_v50 = vadd.f32 1.0, %v2361_v48 }
 0x44b   : > { %v1870_v51 = vadd.f32 1.0, %v2363_v49 }
 0x44c   : > { %2372 = vrcp.f32 %v1871_v50 }
 0x44d   : > { %2374 = vrcp.f32 %v1870_v51 }
 0x44e   : > { %v2365_v52 = vpop.eup %2364 }
 0x44f   : > { %v2367_v53 = vpop.eup %2366  ;;  %1892 = vrot.lane.b32.xlu1 %v2365_v52, %s2384_s21 }
 0x450   : > { %1890 = vrot.lane.b32.xlu0 %v2367_v53, %s2384_s21 }
 0x452   : > { %v2369_v54 = vpop.eup %2368 }
 0x453   : > { %v2371_v55 = vpop.eup %2370  ;;  %1896 = vrot.lane.b32.xlu1 %v2369_v54, %s2384_s21 }
 0x454   : > { %1894 = vrot.lane.b32.xlu0 %v2371_v55, %s2384_s21 }
 0x456   : > { %v2373_v56 = vpop.eup %2372 }
 0x457   : > { %v2375_v57 = vpop.eup %2374  ;;  %1900 = vrot.lane.b32.xlu1 %v2373_v56, %s2384_s21 }
 0x458   : > { %1898 = vrot.lane.b32.xlu0 %v2375_v57, %s2384_s21 }
 0x4c1   : > { %v1893_v59 = vpop.permute.xlu1 %1892 }
 0x4c2   : > { %v1909_v61 = vmul.f32 %v1893_v59, %v1843_v58  ;;  %v1891_v62 = vpop.permute.xlu0 %1890 }
 0x4c3   : > { %v1908_v63 = vmul.f32 %v1891_v62, %v1842_v60 }
 0x4c4   : > { %1915 = vst.msk [vmem:[%s305_s17 + $0x8] sm:$0xff] %vm318_vm0, %v1909_v61 }
 0x4c5   : > { %1914 = vst.msk [vmem:[%s305_s17] sm:$0xff] %vm318_vm0, %v1908_v63  ;;  %v1897_v2 = vpop.permute.xlu1 %1896 }
 0x4c6   : > { %v1911_v6 = vmul.f32 %v1897_v2, %v1845_v1  ;;  %v1895_v13 = vpop.permute.xlu0 %1894 }
 0x4c7   : > { %v1910_v14 = vmul.f32 %v1895_v13, %v1844_v3 }
 0x4c8   : > { %1917 = vst.msk [vmem:[%s305_s17 + $0x18] sm:$0xff] %vm318_vm0, %v1911_v6 }
 0x4c9   : > { %1916 = vst.msk [vmem:[%s305_s17 + $0x10] sm:$0xff] %vm318_vm0, %v1910_v14  ;;  %v1901_v15 = vpop.permute.xlu1 %1900 }
 0x4ca   : > { %v1913_v18 = vmul.f32 %v1901_v15, %v1847_v0  ;;  %v1899_v19 = vpop.permute.xlu0 %1898 }
 0x4cb   : > { %v1912_v20 = vmul.f32 %v1899_v19, %v1846_v17 }
 0x4cc   : > { %1919 = vst.msk [vmem:[%s305_s17 + $0x28] sm:$0xff] %vm318_vm0, %v1913_v18 }
 0x4cd   : > { %1918 = vst.msk [vmem:[%s305_s17 + $0x20] sm:$0xff] %vm318_vm0, %v1912_v20 }
 0x4ce PF: > { %s18_s27 = sadd.s32 1, %s2382_s27  }
 0x4cf   : > { %p15_p4 = scmp.ge.s32.totalorder %s18_s27, 6  }
 0x4d1   :  { %17 = sbr.rel (!%p15_p4) target bundleno = 1 (0x1), region = 86 }

</bundles_post_ra>
